<compile_context>
chip_gen: v6e
topology: v6e:2x2x1
jax: 0.10.0
libtpu: 0.0.40
codegen_flags: <defaults>
</compile_context>

<pallas_src>
import math
import functools

import jax
import jax.numpy as jnp
from jax import lax
from jax.experimental import pallas as pl
from jax.experimental.pallas import tpu as pltpu


# ---------------------------------------------------------------------------
# Fused encoder + attention-decoder kernel
# ---------------------------------------------------------------------------
def _fused_enc_dec_kernel(bb, s_enc, s_dec,
                          enc_ref, dec_ref,
                          w_enc_ref, b_enc_ref,
                          w_q_ref, b_q_ref,
                          w_out_ctx_ref, w_out_q_ref, b_out_ref,
                          out_ref, *attn_refs):
    # enc_ref: (bb*S_enc, D)  dec_ref: (bb*S_dec, D)   [flattened in wrapper]
    # w_enc/w_q: (D, H)  b_enc/b_q: (1, H) f32
    # w_out_ctx/w_out_q: (H, O_pad)  b_out: (1, O_pad) f32
    # out_ref: (bb*S_dec, O_pad)   attn_refs[0] (optional): (bb*S_dec, S_enc)
    h = w_enc_ref.shape[1]
    act_dtype = dec_ref.dtype   # bf16: MXU operands stay in this dtype

    # -- encoder: enc_h = tanh(enc_x @ W_enc + b_enc)  (f32 accumulate)
    enc_h = jnp.tanh(
        jnp.dot(enc_ref[...], w_enc_ref[...], preferred_element_type=jnp.float32)
        + b_enc_ref[...]
    ).astype(act_dtype)                                      # (bb*S_enc, H)

    # -- decoder query projection. W_q/b_q are pre-scaled by 1/sqrt(H) in the
    #    wrapper, so q is already the scaled query; W_out_q is compensated.
    q = (jnp.dot(dec_ref[...], w_q_ref[...], preferred_element_type=jnp.float32)
         + b_q_ref[...]).astype(act_dtype)                   # (bb*S_dec, H)

    # -- attention scores: batched, contraction on last dims (no transpose)
    kv3 = enc_h.reshape(bb, s_enc, h)
    q3 = q.reshape(bb, s_dec, h)
    scores = lax.dot_general(
        q3, kv3,
        dimension_numbers=(((2,), (2,)), ((0,), (0,))),
        preferred_element_type=jnp.float32)                  # (bb, S_dec, S_enc)

    # -- softmax in f32; divide goes to the EUP via approx reciprocal
    m = jnp.max(scores, axis=-1, keepdims=True)
    p = jnp.exp(scores - m)
    denom = jnp.sum(p, axis=-1, keepdims=True)
    attn = p * pl.reciprocal(denom, approx=True)             # f32 (bb,S_dec,S_enc)

    # -- context: attn @ enc_out (batched, MXU operands in act dtype)
    ctx = lax.dot_general(
        attn.astype(act_dtype), kv3,
        dimension_numbers=(((2,), (1,)), ((0,), (0,))),
        preferred_element_type=jnp.float32
    ).reshape(bb * s_dec, h).astype(act_dtype)               # (bb*S_dec, H)

    # -- output projection, concat-free:
    #    concat([ctx, q_unscaled]) @ W_out == ctx @ W_ctx + q @ (W_q_tail/scale)
    out = (jnp.dot(ctx, w_out_ctx_ref[...], preferred_element_type=jnp.float32)
           + jnp.dot(q, w_out_q_ref[...], preferred_element_type=jnp.float32)
           + b_out_ref[...])
    out_ref[...] = out.astype(out_ref.dtype)

    if attn_refs:   # optional attention-weights writeback (compute dtype)
        attn_refs[0][...] = attn.reshape(bb * s_dec, s_enc).astype(attn_refs[0].dtype)


# ---------------------------------------------------------------------------
# Wrapper: single fused pallas_call, batch-tiled grid
# ---------------------------------------------------------------------------
def encoder_decoder_forward(enc_x, dec_x, params, *,
                            return_attention=False,
                            batch_block=None,
                            compute_dtype=jnp.bfloat16,
                            vmem_limit_bytes=48 * 1024 * 1024):
    """Mirrors EncoderDecoder.forward: enc -> init_state -> dec, fused."""
    B, S_enc, D = enc_x.shape
    _, S_dec, _ = dec_x.shape
    H = params["w_enc"].shape[1]
    O = params["w_out"].shape[1]
    cdt = jnp.dtype(compute_dtype)

    # -- batch tiling: aim for >=2 steps (v7x megacore) and up to 4 (pipelining),
    #    keeping flattened block rows a multiple of 8 (the (8,128) rule).
    if batch_block is None:
        target_steps = min(B, 4)
        batch_block = B
        for bb in range(max(1, B // target_steps), B + 1):
            if B % bb == 0 and (bb * S_enc) % 8 == 0 and (bb * S_dec) % 8 == 0:
                batch_block = bb
                break
    assert B % batch_block == 0, "batch_block must divide B"
    assert batch_block == B or (
        (batch_block * S_enc) % 8 == 0 and (batch_block * S_dec) % 8 == 0
    ), "flattened block rows (batch_block*S) must be multiples of 8"
    n_steps = B // batch_block

    scale = 1.0 / math.sqrt(H)

    # -- fold 1/sqrt(H) into the Q projection; compensate in the output weights.
    w_q_s = params["w_q"] * scale
    b_q_s = params["b_q"] * scale
    # Split W_out so the kernel never does a lane-axis concat.
    w_out_ctx = params["w_out"][:H]            # (H, O)
    w_out_q = params["w_out"][H:] / scale      # (H, O), compensates scaled q

    # -- lane-dense main output: pad O up to a multiple of 128 (zero columns),
    #    slice back after the call.
    O_pad = 128 * pl.cdiv(O, 128)
    b_out = params["b_out"]
    if O_pad != O:
        pad = ((0, 0), (0, O_pad - O))
        w_out_ctx = jnp.pad(w_out_ctx, pad)
        w_out_q = jnp.pad(w_out_q, pad)
        b_out = jnp.pad(b_out, pad)

    # -- bf16 MXU operands (f32 accumulation in-kernel); biases stay f32.
    enc_flat = enc_x.reshape(B * S_enc, D).astype(cdt)
    dec_flat = dec_x.reshape(B * S_dec, D).astype(cdt)
    w_enc = params["w_enc"].astype(cdt)
    w_q_s = w_q_s.astype(cdt)
    w_out_ctx = w_out_ctx.astype(cdt)
    w_out_q = w_out_q.astype(cdt)
    b_enc = params["b_enc"].astype(jnp.float32)
    b_q_s = b_q_s.astype(jnp.float32)
    b_out = b_out.astype(jnp.float32)

    # -- advisory cost estimate for XLA's scheduler
    itm = cdt.itemsize
    flops = (2 * B * S_enc * D * H              # encoder matmul
             + 2 * B * S_dec * D * H            # q projection
             + 2 * B * S_dec * S_enc * H        # scores
             + 2 * B * S_dec * S_enc * H        # context
             + 2 * 2 * B * S_dec * H * O_pad)   # two output matmuls
    transcendentals = B * S_enc * H + B * S_dec * S_enc + B * S_dec
    bytes_accessed = (
        (enc_flat.size + dec_flat.size + w_enc.size + w_q_s.size
         + w_out_ctx.size + w_out_q.size) * itm
        + (b_enc.size + b_q_s.size + b_out.size) * 4
        + B * S_dec * O_pad * itm
        + (B * S_dec * S_enc * itm if return_attention else 0))
    cost = pl.CostEstimate(flops=flops, transcendentals=transcendentals,
                           bytes_accessed=bytes_accessed)

    kernel = functools.partial(_fused_enc_dec_kernel, batch_block, S_enc, S_dec)

    out_shapes = [jax.ShapeDtypeStruct((B * S_dec, O_pad), cdt)]
    out_specs = [pl.BlockSpec((batch_block * S_dec, O_pad), lambda i: (i, 0))]
    if return_attention:
        out_shapes.append(jax.ShapeDtypeStruct((B * S_dec, S_enc), cdt))
        out_specs.append(pl.BlockSpec((batch_block * S_dec, S_enc), lambda i: (i, 0)))

    const2 = lambda i: (0, 0)   # weights stay VMEM-resident across steps
    # TODO(synk): single-buffer the constant weight blocks (pl.Buffered(1) or a
    # DMA-once-to-scratch path) when D/H/O grow large enough to matter on v7x.

    outs = pl.pallas_call(
        kernel,
        out_shape=tuple(out_shapes),
        grid=(n_steps,),
        in_specs=[
            pl.BlockSpec((batch_block * S_enc, D), lambda i: (i, 0)),
            pl.BlockSpec((batch_block * S_dec, D), lambda i: (i, 0)),
            pl.BlockSpec((D, H), const2),
            pl.BlockSpec((1, H), const2),
            pl.BlockSpec((D, H), const2),
            pl.BlockSpec((1, H), const2),
            pl.BlockSpec((H, O_pad), const2),
            pl.BlockSpec((H, O_pad), const2),
            pl.BlockSpec((1, O_pad), const2),
        ],
        out_specs=tuple(out_specs),
        compiler_params=pltpu.CompilerParams(
            # batch-tile axis is "parallel" so it shards across v7x's two TCs.
            dimension_semantics=("parallel",),
            vmem_limit_bytes=vmem_limit_bytes),
        cost_estimate=cost,
    )(enc_flat, dec_flat, w_enc, b_enc, w_q_s, b_q_s, w_out_ctx, w_out_q, b_out)

    out = outs[0].reshape(B, S_dec, O_pad)[..., :O]
    if return_attention:
        return out, outs[1].reshape(B, S_dec, S_enc)
    return out


def init_params(key, d_in, hidden, d_out):
    ks = jax.random.split(key, 6)
    s_enc = 1.0 / math.sqrt(d_in)
    s_out = 1.0 / math.sqrt(2 * hidden)
    return {
        "w_enc": jax.random.uniform(ks[0], (d_in, hidden), jnp.float32, -s_enc, s_enc),
        "b_enc": jax.random.uniform(ks[1], (1, hidden), jnp.float32, -s_enc, s_enc),
        "w_q":   jax.random.uniform(ks[2], (d_in, hidden), jnp.float32, -s_enc, s_enc),
        "b_q":   jax.random.uniform(ks[3], (1, hidden), jnp.float32, -s_enc, s_enc),
        "w_out": jax.random.uniform(ks[4], (2 * hidden, d_out), jnp.float32, -s_out, s_out),
        "b_out": jax.random.uniform(ks[5], (1, d_out), jnp.float32, -s_out, s_out),
    }


# ---------------------------------------------------------------------------
# Reference (pure JAX, f32) for sanity checking
# ---------------------------------------------------------------------------
def _reference(enc_x, dec_x, p):
    enc_out = jnp.tanh(enc_x @ p["w_enc"] + p["b_enc"])
    q = dec_x @ p["w_q"] + p["b_q"]
    scores = jnp.einsum("bqd,bkd->bqk", q, enc_out) / math.sqrt(enc_out.shape[-1])
    attn = jax.nn.softmax(scores, axis=-1)
    ctx = jnp.einsum("bqk,bkd->bqd", attn, enc_out)
    out = jnp.concatenate([ctx, q], axis=-1) @ p["w_out"] + p["b_out"]
    return out, attn


if __name__ == "__main__":
    # TODO(synk): the PyTorch base class is abstract; a concrete attention
    # encoder-decoder (tanh-proj encoder + scaled-dot-product-attention decoder)
    # is instantiated here deterministically.
    B, S_ENC, S_DEC, D_IN, HIDDEN, D_OUT = 2, 8, 8, 32, 32, 32

    root = jax.random.PRNGKey(0)
    k_enc, k_dec, k_par = jax.random.split(root, 3)
    enc_X = jax.random.normal(k_enc, (B, S_ENC, D_IN), jnp.float32)
    dec_X = jax.random.normal(k_dec, (B, S_DEC, D_IN), jnp.float32)
    params = init_params(k_par, D_IN, HIDDEN, D_OUT)

    # With attention-weights writeback (for verification).
    out, attn = encoder_decoder_forward(enc_X, dec_X, params, return_attention=True)
    out = jax.block_until_ready(out)
    attn = jax.block_until_ready(attn)

    # Default fast path: no attn HBM writeback.
    out_only = jax.block_until_ready(encoder_decoder_forward(enc_X, dec_X, params))

    ref_out, ref_attn = _reference(enc_X, dec_X, params)
    assert out.shape == (B, S_DEC, D_OUT)
    assert attn.shape == (B, S_DEC, S_ENC)
    # Tolerance 5e-2: bf16 MXU operands (f32 accumulation) + approx-reciprocal
    # softmax divide, compared against a pure-f32 reference.
    assert jnp.allclose(out.astype(jnp.float32), ref_out, atol=5e-2, rtol=5e-2)
    assert jnp.allclose(attn.astype(jnp.float32), ref_attn, atol=5e-2, rtol=5e-2)
    assert jnp.allclose(out_only.astype(jnp.float32), ref_out, atol=5e-2, rtol=5e-2)

    print("KERNEL_OK")
</pallas_src>

<mosaic_0001>
module attributes {stable_mosaic.version = 11 : i64} {
  func.func @_fused_enc_dec_kernel(%arg0: i32, %arg1: memref<8x32xbf16, #tpu.memory_space<vmem>>, %arg2: memref<8x32xbf16, #tpu.memory_space<vmem>>, %arg3: memref<32x32xbf16, #tpu.memory_space<vmem>>, %arg4: memref<1x32xf32, #tpu.memory_space<vmem>>, %arg5: memref<32x32xbf16, #tpu.memory_space<vmem>>, %arg6: memref<1x32xf32, #tpu.memory_space<vmem>>, %arg7: memref<32x128xbf16, #tpu.memory_space<vmem>>, %arg8: memref<32x128xbf16, #tpu.memory_space<vmem>>, %arg9: memref<1x128xf32, #tpu.memory_space<vmem>>, %arg10: memref<8x128xbf16, #tpu.memory_space<vmem>>, %arg11: memref<8x8xbf16, #tpu.memory_space<vmem>>) attributes {dimension_semantics = [#tpu.dimension_semantics<parallel>], iteration_bounds = array<i64: 2>, scalar_prefetch = 0 : i64, scratch_operands = 0 : i64, tpu.core_type = #tpu.core_type<tc>, window_params = [{transform_indices = @transform_0, window_bounds = array<i64: 8, 32>}, {transform_indices = @transform_1, window_bounds = array<i64: 8, 32>}, {pipeline_mode = #tpu.pipeline_mode<synchronous>, transform_indices = @transform_2, window_bounds = array<i64: 32, 32>}, {pipeline_mode = #tpu.pipeline_mode<synchronous>, transform_indices = @transform_3, window_bounds = array<i64: 1, 32>}, {pipeline_mode = #tpu.pipeline_mode<synchronous>, transform_indices = @transform_4, window_bounds = array<i64: 32, 32>}, {pipeline_mode = #tpu.pipeline_mode<synchronous>, transform_indices = @transform_5, window_bounds = array<i64: 1, 32>}, {pipeline_mode = #tpu.pipeline_mode<synchronous>, transform_indices = @transform_6, window_bounds = array<i64: 32, 128>}, {pipeline_mode = #tpu.pipeline_mode<synchronous>, transform_indices = @transform_7, window_bounds = array<i64: 32, 128>}, {pipeline_mode = #tpu.pipeline_mode<synchronous>, transform_indices = @transform_8, window_bounds = array<i64: 1, 128>}, {transform_indices = @transform_9, window_bounds = array<i64: 8, 128>}, {transform_indices = @transform_10, window_bounds = array<i64: 8, 8>}]} {
    %c0 = arith.constant 0 : index
    %c0_0 = arith.constant 0 : index
    %0 = vector.load %arg1[%c0, %c0_0] : memref<8x32xbf16, #tpu.memory_space<vmem>>, vector<8x32xbf16>
    %c0_1 = arith.constant 0 : index
    %c0_2 = arith.constant 0 : index
    %1 = vector.load %arg3[%c0_1, %c0_2] : memref<32x32xbf16, #tpu.memory_space<vmem>>, vector<32x32xbf16>
    %cst = arith.constant dense<0.000000e+00> : vector<8x32xf32>
    %2 = tpu.matmul %0, %1, %cst {dimension_numbers = #tpu.dot_dimension_numbers<[1], [0], [0], [1], [0, 0, 1, 1], [], []>} : vector<8x32xbf16>, vector<32x32xbf16>, vector<8x32xf32> -> vector<8x32xf32>
    %c0_3 = arith.constant 0 : index
    %c0_4 = arith.constant 0 : index
    %3 = vector.load %arg4[%c0_3, %c0_4] : memref<1x32xf32, #tpu.memory_space<vmem>>, vector<1x32xf32>
    %4 = vector.broadcast %3 : vector<1x32xf32> to vector<8x32xf32>
    %5 = arith.addf %2, %4 : vector<8x32xf32>
    %6 = math.tanh %5 : vector<8x32xf32>
    %7 = arith.truncf %6 : vector<8x32xf32> to vector<8x32xbf16>
    %c0_5 = arith.constant 0 : index
    %c0_6 = arith.constant 0 : index
    %8 = vector.load %arg2[%c0_5, %c0_6] : memref<8x32xbf16, #tpu.memory_space<vmem>>, vector<8x32xbf16>
    %c0_7 = arith.constant 0 : index
    %c0_8 = arith.constant 0 : index
    %9 = vector.load %arg5[%c0_7, %c0_8] : memref<32x32xbf16, #tpu.memory_space<vmem>>, vector<32x32xbf16>
    %cst_9 = arith.constant dense<0.000000e+00> : vector<8x32xf32>
    %10 = tpu.matmul %8, %9, %cst_9 {dimension_numbers = #tpu.dot_dimension_numbers<[1], [0], [0], [1], [0, 0, 1, 1], [], []>} : vector<8x32xbf16>, vector<32x32xbf16>, vector<8x32xf32> -> vector<8x32xf32>
    %c0_10 = arith.constant 0 : index
    %c0_11 = arith.constant 0 : index
    %11 = vector.load %arg6[%c0_10, %c0_11] : memref<1x32xf32, #tpu.memory_space<vmem>>, vector<1x32xf32>
    %12 = vector.broadcast %11 : vector<1x32xf32> to vector<8x32xf32>
    %13 = arith.addf %10, %12 : vector<8x32xf32>
    %14 = arith.truncf %13 : vector<8x32xf32> to vector<8x32xbf16>
    %15 = vector.shape_cast %7 : vector<8x32xbf16> to vector<1x8x32xbf16>
    %16 = vector.shape_cast %14 : vector<8x32xbf16> to vector<1x8x32xbf16>
    %cst_12 = arith.constant dense<0.000000e+00> : vector<1x8x8xf32>
    %17 = tpu.matmul %16, %15, %cst_12 {dimension_numbers = #tpu.dot_dimension_numbers<[2], [2], [1], [1], [0, 0, 0, 1, 1, 1], [0], [0]>} : vector<1x8x32xbf16>, vector<1x8x32xbf16>, vector<1x8x8xf32> -> vector<1x8x8xf32>
    %cst_13 = arith.constant dense<0xFF800000> : vector<1x8xf32>
    %18 = vector.multi_reduction <maximumf>, %17, %cst_13 [2] : vector<1x8x8xf32> to vector<1x8xf32>
    %19 = vector.shape_cast %18 : vector<1x8xf32> to vector<1x8x1xf32>
    %20 = vector.broadcast %19 : vector<1x8x1xf32> to vector<1x8x8xf32>
    %21 = arith.subf %17, %20 : vector<1x8x8xf32>
    %22 = math.exp %21 : vector<1x8x8xf32>
    %cst_14 = arith.constant dense<0.000000e+00> : vector<1x8xf32>
    %23 = vector.multi_reduction <add>, %22, %cst_14 [2] : vector<1x8x8xf32> to vector<1x8xf32>
    %24 = vector.shape_cast %23 : vector<1x8xf32> to vector<1x8x1xf32>
    %25 = tpu.reciprocal %24 {approx = true} : vector<1x8x1xf32> -> vector<1x8x1xf32>
    %26 = vector.broadcast %25 : vector<1x8x1xf32> to vector<1x8x8xf32>
    %27 = arith.mulf %22, %26 : vector<1x8x8xf32>
    %28 = arith.truncf %27 : vector<1x8x8xf32> to vector<1x8x8xbf16>
    %cst_15 = arith.constant dense<0.000000e+00> : vector<1x8x32xf32>
    %29 = tpu.matmul %28, %15, %cst_15 {dimension_numbers = #tpu.dot_dimension_numbers<[2], [1], [1], [2], [0, 0, 0, 1, 1, 2], [0], [0]>} : vector<1x8x8xbf16>, vector<1x8x32xbf16>, vector<1x8x32xf32> -> vector<1x8x32xf32>
    %30 = vector.shape_cast %29 : vector<1x8x32xf32> to vector<8x32xf32>
    %31 = arith.truncf %30 : vector<8x32xf32> to vector<8x32xbf16>
    %c0_16 = arith.constant 0 : index
    %c0_17 = arith.constant 0 : index
    %32 = vector.load %arg7[%c0_16, %c0_17] : memref<32x128xbf16, #tpu.memory_space<vmem>>, vector<32x128xbf16>
    %cst_18 = arith.constant dense<0.000000e+00> : vector<8x128xf32>
    %33 = tpu.matmul %31, %32, %cst_18 {dimension_numbers = #tpu.dot_dimension_numbers<[1], [0], [0], [1], [0, 0, 1, 1], [], []>} : vector<8x32xbf16>, vector<32x128xbf16>, vector<8x128xf32> -> vector<8x128xf32>
    %c0_19 = arith.constant 0 : index
    %c0_20 = arith.constant 0 : index
    %34 = vector.load %arg8[%c0_19, %c0_20] : memref<32x128xbf16, #tpu.memory_space<vmem>>, vector<32x128xbf16>
    %cst_21 = arith.constant dense<0.000000e+00> : vector<8x128xf32>
    %35 = tpu.matmul %14, %34, %cst_21 {dimension_numbers = #tpu.dot_dimension_numbers<[1], [0], [0], [1], [0, 0, 1, 1], [], []>} : vector<8x32xbf16>, vector<32x128xbf16>, vector<8x128xf32> -> vector<8x128xf32>
    %36 = arith.addf %33, %35 : vector<8x128xf32>
    %c0_22 = arith.constant 0 : index
    %c0_23 = arith.constant 0 : index
    %37 = vector.load %arg9[%c0_22, %c0_23] : memref<1x128xf32, #tpu.memory_space<vmem>>, vector<1x128xf32>
    %38 = vector.broadcast %37 : vector<1x128xf32> to vector<8x128xf32>
    %39 = arith.addf %36, %38 : vector<8x128xf32>
    %40 = arith.truncf %39 : vector<8x128xf32> to vector<8x128xbf16>
    %c0_24 = arith.constant 0 : index
    %c0_25 = arith.constant 0 : index
    %41 = vector.load %arg10[%c0_24, %c0_25] : memref<8x128xbf16, #tpu.memory_space<vmem>>, vector<8x128xbf16>
    tpu.vector_store %arg10[%c0_24, %c0_25], %40 {strides = array<i32>} : memref<8x128xbf16, #tpu.memory_space<vmem>>, vector<8x128xbf16>,
    %42 = vector.shape_cast %27 : vector<1x8x8xf32> to vector<8x8xf32>
    %43 = arith.truncf %42 : vector<8x8xf32> to vector<8x8xbf16>
    %c0_26 = arith.constant 0 : index
    %c0_27 = arith.constant 0 : index
    %44 = vector.load %arg11[%c0_26, %c0_27] : memref<8x8xbf16, #tpu.memory_space<vmem>>, vector<8x8xbf16>
    tpu.vector_store %arg11[%c0_26, %c0_27], %43 {strides = array<i32>} : memref<8x8xbf16, #tpu.memory_space<vmem>>, vector<8x8xbf16>,
    return
  }
  func.func @transform_0(%arg0: i32) -> (i32, i32) {
    %c0_i32 = arith.constant 0 : i32
    %c0_i32_0 = arith.constant 0 : i32
    return %arg0, %c0_i32 : i32, i32
  }
  func.func @transform_1(%arg0: i32) -> (i32, i32) {
    %c0_i32 = arith.constant 0 : i32
    %c0_i32_0 = arith.constant 0 : i32
    return %arg0, %c0_i32 : i32, i32
  }
  func.func @transform_2(%arg0: i32) -> (i32, i32) {
    %c0_i32 = arith.constant 0 : i32
    %c0_i32_0 = arith.constant 0 : i32
    %c0_i32_1 = arith.constant 0 : i32
    return %c0_i32, %c0_i32_0 : i32, i32
  }
  func.func @transform_3(%arg0: i32) -> (i32, i32) {
    %c0_i32 = arith.constant 0 : i32
    %c0_i32_0 = arith.constant 0 : i32
    %c0_i32_1 = arith.constant 0 : i32
    return %c0_i32, %c0_i32_0 : i32, i32
  }
  func.func @transform_4(%arg0: i32) -> (i32, i32) {
    %c0_i32 = arith.constant 0 : i32
    %c0_i32_0 = arith.constant 0 : i32
    %c0_i32_1 = arith.constant 0 : i32
    return %c0_i32, %c0_i32_0 : i32, i32
  }
  func.func @transform_5(%arg0: i32) -> (i32, i32) {
    %c0_i32 = arith.constant 0 : i32
    %c0_i32_0 = arith.constant 0 : i32
    %c0_i32_1 = arith.constant 0 : i32
    return %c0_i32, %c0_i32_0 : i32, i32
  }
  func.func @transform_6(%arg0: i32) -> (i32, i32) {
    %c0_i32 = arith.constant 0 : i32
    %c0_i32_0 = arith.constant 0 : i32
    %c0_i32_1 = arith.constant 0 : i32
    return %c0_i32, %c0_i32_0 : i32, i32
  }
  func.func @transform_7(%arg0: i32) -> (i32, i32) {
    %c0_i32 = arith.constant 0 : i32
    %c0_i32_0 = arith.constant 0 : i32
    %c0_i32_1 = arith.constant 0 : i32
    return %c0_i32, %c0_i32_0 : i32, i32
  }
  func.func @transform_8(%arg0: i32) -> (i32, i32) {
    %c0_i32 = arith.constant 0 : i32
    %c0_i32_0 = arith.constant 0 : i32
    %c0_i32_1 = arith.constant 0 : i32
    return %c0_i32, %c0_i32_0 : i32, i32
  }
  func.func @transform_9(%arg0: i32) -> (i32, i32) {
    %c0_i32 = arith.constant 0 : i32
    %c0_i32_0 = arith.constant 0 : i32
    return %arg0, %c0_i32 : i32, i32
  }
  func.func @transform_10(%arg0: i32) -> (i32, i32) {
    %c0_i32 = arith.constant 0 : i32
    %c0_i32_0 = arith.constant 0 : i32
    return %arg0, %c0_i32 : i32, i32
  }
}

</mosaic_0001>

<bundles_post_ra>
// kernel: tpu_custom_call.1
= control target key start
LH: loop header
LB: loop body
LE: loop exit
PB: predicated region body
PF: predicated region fallthrough
CT: control target
= control target key end

     0   :  { %s1870_s0 = inlined_call_operand.hbm [shape: bf16[16,32], index: 0, kind: input, shape index: {}]   ;;  %s1871_s1 = inlined_call_operand.hbm [shape: bf16[16,32], index: 1, kind: input, shape index: {}]   ;;  %s1872_s2 = inlined_call_operand.hbm [shape: bf16[32,32], index: 2, kind: input, shape index: {}]   ;;  %s1873_s3 = inlined_call_operand.vmem [shape: f32[1,32], index: 3, kind: input, shape index: {}]   ;;  %s1874_s4 = inlined_call_operand.hbm [shape: bf16[32,32], index: 4, kind: input, shape index: {}]   ;;  %s1875_s5 = inlined_call_operand.vmem [shape: f32[1,32], index: 5, kind: input, shape index: {}]   ;;  %s1876_s6 = inlined_call_operand.hbm [shape: bf16[32,128], index: 6, kind: input, shape index: {}]   ;;  %s1877_s7 = inlined_call_operand.hbm [shape: bf16[32,128], index: 7, kind: input, shape index: {}]   ;;  %s1878_s8 = inlined_call_operand.vmem [shape: f32[1,128], index: 8, kind: input, shape index: {}]   ;;  %s1879_s9 = inlined_call_operand.hbm [shape: bf16[16,128], index: 9, kind: output, shape index: {0}]   ;;  %s1880_s10 = inlined_call_operand.vmem [shape: bf16[16,8], index: 10, kind: output, shape index: {1}]  }
   0x1   :  { %1888 = sst [smem:[#allocation23_spill]] %s1872_s2 }
   0x2   :  { %1889 = sst [smem:[#allocation24_spill]] %s1874_s4 }
   0x3   :  { %1890 = sst [smem:[#allocation25_spill]] %s1876_s6 }
   0x4   :  { %1891 = sst [smem:[#allocation26_spill]] %s1877_s7 }
   0x5   :  { %16 = vsyncpa [#allocation3], 0 }
   0x6   :  { %18 = vsyncpa [#allocation3 + $0x1], 0 }
   0x7   :  { %19 = vsyncpa [#allocation6], 0 }
   0x8   :  { %21 = vsyncpa [#allocation6 + $0x1], 0 }
   0x9   :  { %22 = vsyncpa [#allocation9], 0 }
   0xa   :  { %23 = vsyncpa [#allocation12], 0 }
   0xb   :  { %24 = vsyncpa [#allocation4], 0 }
   0xc   :  { %26 = vsyncpa [#allocation4 + $0x1], 0  ;;  %s1548_s13 = smov 0   ;;  %s1550_s14 = smov 0  }
   0xd   :  { %s1552_s15 = smov 0   ;;  %s1554_s16 = smov 0  }
   0xe LB: > { %1892 = sst [smem:[#allocation20_spill]] %s1476_s15  ;;  %s1482_s17 = smov [#allocation7]   ;;  %s1480_s16 = sphi %s1554_s16, %s1917_s16   ;;  %s1476_s15 = sphi %s1552_s15, %s1919_s15   ;;  %s1472_s14 = sphi %s1550_s14, %s1921_s14   ;;  %s1468_s13 = sphi %s1548_s13, %s1920_s13  }
   0xf   : > { %s300_s18 = sshll.u32 %s1482_s17, 4  ;;  %s1569_s19 = sadd.s32 4294967295, %s1480_s16   ;;  %s301_s18 = int_to_ptr.vmem [resolvable:$true] %s300_s18 }
  0x10   : > { %p1030_p0 = scmp.ge.s32.totalorder %s1480_s16, 1  ;;  %p1884_p1 = scmp.eq.s32.totalorder %s1569_s19, 0 }
  0x11   : > { %p288_p2 = scmp.lt.s32.totalorder %s1480_s16, 3  ;;  %s1483_s21 = smov [#allocation8]  }
  0x12   : > { %s316_s22 = sshll.u32 %s1483_s21, 4  ;;  %s1484_s24 = smov [#allocation10]   ;;  %s1587_s22 = int_to_ptr.vmem [resolvable:$true] %s316_s22 }
  0x13   : > { %p1574_p3 = pnand %p1030_p0, %p288_p2  ;;  %s332_s25 = sshll.u32 %s1484_s24, 4  ;;  %s1589_s25 = int_to_ptr.vmem [resolvable:$true] %s332_s25 }
  0x14   : > { %s1251_s26 = scalar_lea.vmem %s301_s18, 256  ;;  %p1259_p11 = scmp.lt.s32.totalorder %s301_s18, %s301_s18 }
  0x15   : > { %s1893_s20 = scalar_select %p1574_p3, 1, 0 }
  0x16   : > { %p1152_p5 = pneg %p1574_p3  ;;  %p1252_p8 = scmp.ne.s32.totalorder %s301_s18, %s1251_s26 }
  0x17   : > { %p1260_p12 = scmp.lt.s32.totalorder %s1251_s26, %s1251_s26 }
  0x18   : > { %p1583_p6 = pnand %p1152_p5, %p1884_p1 }
  0x19   : > { %p1261_p13 = por %p1260_p12, %p1259_p11 }
  0x1a   : > { %p1242_p7 = pneg %p1583_p6 }
  0x1c   : > { %p1254_p9 = pnand %p1252_p8, %p1242_p7 }
  0x1e   : > { %p1255_p10 = pneg %p1254_p9 }
  0x20   : > { %p1262_p0 = pnand %p1261_p13, %p1255_p10 }
  0x22   : > { %1265 = shalt.err (!%p1262_p0)
}
  0x23   : > { %s1485_s27 = smov 64   ;;  %s1486_s28 = smov 4  }
  0x24   : > { %s1895_s2 = sld [smem:[#allocation23_spill]]  ;;  %s1277_s11 = scalar_lea.vmem %s1587_s22, 256 }
  0x25   : > { %p1278_p2 = scmp.ne.s32.totalorder %s1587_s22, %s1277_s11  ;;  %p1285_p9 = scmp.lt.s32.totalorder %s1587_s22, %s1587_s22 }
  0x26   : > { %p1286_p10 = scmp.lt.s32.totalorder %s1277_s11, %s1277_s11 }
  0x27   : > { %p1280_p5 = pnand %p1278_p2, %p1242_p7 }
  0x28   : > { %p1287_p11 = por %p1286_p10, %p1285_p9 }
  0x29   : > { %p1281_p8 = pneg %p1280_p5 }
  0x2a   : > { %1155 = dma.hbm_to_vmem [thread:$0]  (!%p1583_p6), %s1895_s2, 256, %s301_s18, [#allocation6], %s1485_s27, %s1485_s27, %s1486_s28  }
  0x2b   : > { %p1288_p12 = pnand %p1287_p11, %p1281_p8 }
  0x2d   : > { %1291 = shalt.err (!%p1288_p12)
}
  0x2e   : > { %s1896_s4 = sld [smem:[#allocation24_spill]]  ;;  %s1303_s18 = scalar_lea.vmem %s1589_s25, 256 }
  0x2f   : > { %p1304_p13 = scmp.ne.s32.totalorder %s1589_s25, %s1303_s18  ;;  %p1311_p5 = scmp.lt.s32.totalorder %s1589_s25, %s1589_s25 }
  0x30   : > { %p1312_p8 = scmp.lt.s32.totalorder %s1303_s18, %s1303_s18 }
  0x31   : > { %p1306_p0 = pnand %p1304_p13, %p1242_p7 }
  0x32   : > { %p1313_p9 = por %p1312_p8, %p1311_p5 }
  0x33   : > { %p1307_p2 = pneg %p1306_p0 }
  0x34   : > { %1158 = dma.hbm_to_vmem [thread:$0]  (!%p1583_p6), %s1896_s4, 256, %s1587_s22, [#allocation9], %s1485_s27, %s1485_s27, %s1486_s28  }
  0x35   : > { %p1314_p10 = pnand %p1313_p9, %p1307_p2 }
  0x37   : > { %1317 = shalt.err (!%p1314_p10)
}
  0x38   : > { %s1897_s6 = sld [smem:[#allocation25_spill]]  ;;  %s1487_s24 = smov [#allocation11]  }
  0x39   : > { %s345_s26 = sshll.u32 %s1487_s24, 4  ;;  %s346_s26 = int_to_ptr.vmem [resolvable:$true] %s345_s26 }
  0x3a   : > { %s1329_s29 = scalar_lea.vmem %s346_s26, 256  ;;  %p1337_p0 = scmp.lt.s32.totalorder %s346_s26, %s346_s26 }
  0x3b   : > { %p1330_p11 = scmp.ne.s32.totalorder %s346_s26, %s1329_s29  ;;  %p1338_p2 = scmp.lt.s32.totalorder %s1329_s29, %s1329_s29 }
  0x3d   : > { %p1332_p12 = pnand %p1330_p11, %p1242_p7  ;;  %p1339_p5 = por %p1338_p2, %p1337_p0 }
  0x3e   : > { %1161 = dma.hbm_to_vmem [thread:$0]  (!%p1583_p6), %s1897_s6, 256, %s1589_s25, [#allocation9], %s1485_s27, %s1485_s27, %s1486_s28  }
  0x3f   : > { %p1333_p13 = pneg %p1332_p12 }
  0x41   : > { %p1340_p8 = pnand %p1339_p5, %p1333_p13 }
  0x43   : > { %1343 = shalt.err (!%p1340_p8)
}
  0x44   : > { %s1898_s7 = sld [smem:[#allocation26_spill]]  ;;  %s1029_s23 = sadd.s32 4294967294, %s1480_s16  }
  0x45   : > { %s1649_s11 = sadd.s32 1, %s1480_s16   ;;  %s39_s17 = sadd.s32 1, %s1476_s15 }
  0x46   : > { %1899 = sst [smem:[#allocation21_spill]] %s1649_s11  ;;  %s36_s12 = ssub.s32 %s1480_s16, %s1649_s11 }
  0x47   : > { %p37_p7 = scmp.eq.s32.totalorder %s36_s12, 0  ;;  %p46_p9 = scmp.ne.s32.totalorder %s1476_s15, %s1472_s14 }
  0x48   : > { %p47_p10 = scmp.eq.s32.totalorder %s1480_s16, 0  ;;  %p52_p11 = scmp.ne.s32.totalorder %s1472_s14, %s1468_s13 }
  0x49   : > { %s1660_s18 = scalar_select %p37_p7, %s1476_s15, %s39_s17  }
  0x4a   : > { %1164 = dma.hbm_to_vmem [thread:$0]  (!%p1583_p6), %s1898_s7, 256, %s346_s26, [#allocation12], %s1485_s27, %s1485_s27, %s1486_s28  }
  0x4b   : > { %1900 = sst [smem:[#allocation22_spill]] %s1660_s18  ;;  %p1662_p12 = por %p47_p10, %p46_p9 }
  0x4c   : > { %p1668_p6 = por %p1884_p1, %p52_p11  ;;  %p249_p13 = scmp.eq.s32.totalorder %s1569_s19, 1 }
  0x4d   : > { %p255_p0 = scmp.eq.s32.totalorder %s1029_s23, 1  ;;  %p1180_p2 = scmp.lt.s32.totalorder %s1480_s16, 2 }
  0x4e   : > { %s1902_s27 = scalar_select %p1668_p6, 1, 0 }
  0x4f   : > { %s362_s28 = sand.u32 1, %s1476_s15   ;;  %p1675_p5 = por %p249_p13, %p46_p9 }
  0x50   : > { %p1679_p8 = por %p255_p0, %p52_p11  ;;  %s1683_s26 = sshll.u32 %s362_s28, 2 }
  0x51   : > { %s1903_s22 = scalar_select %p1675_p5, 1, 0 }
  0x52   : > { %s1904_s24 = scalar_select %p1679_p8, 1, 0 }
  0x53   : > { %s1037_s29 = sshll.u32 %s1480_s16, 6  ;;  %s366_s23 = scalar_lea.vmem [#allocation2], %s1683_s26 }
  0x54   : > { %s1689_s12 = scalar_lea.hbm %s1870_s0, %s1037_s29  ;;  %s373_s17 = sshll.u32 %s366_s23, 4  ;;  %s1692_s17 = int_to_ptr.vmem [resolvable:$true] %s373_s17 }
  0x55   : > { %p1696_p7 = pnand %p1180_p2, %p1662_p12  ;;  %s1703_s25 = scalar_lea.hbm %s1871_s1, %s1037_s29 }
  0x56   : > { %s380_s30 = sand.u32 1, %s1480_s16   ;;  %s363_s7 = scalar_lea.sflag [#allocation3], %s362_s28 }
  0x57   : > { %s1344_s18 = scalar_lea.hbm %s1689_s12, 64  ;;  %p1346_p10 = pneg %p1696_p7 }
  0x58   : > { %p1345_p9 = scmp.ne.s32.totalorder %s1689_s12, %s1344_s18  ;;  %s1349_s15 = scalar_lea.hbm %s1870_s0, 128 }
  0x59   : > { %p1350_p13 = scmp.lt.s32.totalorder %s1689_s12, %s1870_s0  ;;  %p1351_p0 = scmp.lt.s32.totalorder %s1349_s15, %s1344_s18 }
  0x5a   : > { %p1347_p11 = pnand %p1346_p10, %p1345_p9 }
  0x5b   : > { %p1352_p2 = por %p1351_p0, %p1350_p13 }
  0x5c   : > { %p1348_p12 = pneg %p1347_p11 }
  0x5e   : > { %p1353_p4 = pnand %p1352_p2, %p1348_p12 }
  0x60   : > { %1356 = shalt.err (!%p1353_p4)
}
  0x61   : > { %s1357_s6 = scalar_lea.vmem %s1692_s17, 64  ;;  %s1488_s28 = smov [#allocation2]  }
  0x62   : > { %p1358_p1 = scmp.ne.s32.totalorder %s1692_s17, %s1357_s6  ;;  %s1362_s29 = sshll.u32 %s1488_s28, 4  ;;  %s1363_s29 = int_to_ptr.vmem [resolvable:$false] %s1362_s29 }
  0x63   : > { %s1364_s21 = scalar_lea.vmem %s1363_s29, 128  ;;  %p1365_p8 = scmp.lt.s32.totalorder %s1692_s17, %s1363_s29 }
  0x64   : > { %p1360_p9 = pnand %p1358_p1, %p1346_p10  ;;  %p1366_p5 = scmp.lt.s32.totalorder %s1364_s21, %s1357_s6 }
  0x66   : > { %p1361_p11 = pneg %p1360_p9  ;;  %p1367_p6 = por %p1366_p5, %p1365_p8 }
  0x68   : > { %p1368_p13 = pnand %p1367_p6, %p1361_p11 }
  0x6a   : > { %1371 = shalt.err (!%p1368_p13)
}
  0x6b   : > { %1168 = dma.hbm_to_vmem [thread:$0]  (!%p1696_p7), %s1689_s12, 64, %s1692_s17, %s363_s7  }
  0x6c   : > { %s384_s15 = scalar_lea.vmem [#allocation5], %s1683_s26  ;;  %s381_s18 = scalar_lea.sflag [#allocation6], %s380_s30 }
  0x6d   : > { %s391_s11 = sshll.u32 %s384_s15, 4  ;;  %s1372_s23 = scalar_lea.hbm %s1703_s25, 64  ;;  %s392_s11 = int_to_ptr.vmem [resolvable:$true] %s391_s11 }
  0x6e   : > { %p1373_p1 = scmp.ne.s32.totalorder %s1703_s25, %s1372_s23  ;;  %s1377_s28 = scalar_lea.hbm %s1871_s1, 128 }
  0x6f   : > { %p1378_p5 = scmp.lt.s32.totalorder %s1703_s25, %s1871_s1  ;;  %p1379_p8 = scmp.lt.s32.totalorder %s1377_s28, %s1372_s23 }
  0x70   : > { %p1375_p4 = pnand %p1373_p1, %p1346_p10 }
  0x71   : > { %p1380_p12 = por %p1379_p8, %p1378_p5 }
  0x72   : > { %p1376_p6 = pneg %p1375_p4 }
  0x74   : > { %p1381_p0 = pnand %p1380_p12, %p1376_p6 }
  0x76   : > { %1384 = shalt.err (!%p1381_p0)
}
  0x77   : > { %s1385_s7 = scalar_lea.vmem %s392_s11, 64  ;;  %s1489_s26 = smov [#allocation5]  }
  0x78   : > { %p1386_p2 = scmp.ne.s32.totalorder %s392_s11, %s1385_s7  ;;  %s1390_s12 = sshll.u32 %s1489_s26, 4  ;;  %s1391_s12 = int_to_ptr.vmem [resolvable:$false] %s1390_s12 }
  0x79   : > { %s1392_s17 = scalar_lea.vmem %s1391_s12, 128  ;;  %p1393_p13 = scmp.lt.s32.totalorder %s392_s11, %s1391_s12 }
  0x7a   : > { %p1388_p9 = pnand %p1386_p2, %p1346_p10  ;;  %p1394_p1 = scmp.lt.s32.totalorder %s1392_s17, %s1385_s7 }
  0x7c   : > { %p1389_p11 = pneg %p1388_p9  ;;  %p1395_p4 = por %p1394_p1, %p1393_p13 }
  0x7e   : > { %p1396_p3 = pnand %p1395_p4, %p1389_p11 }
  0x80   : > { %1399 = shalt.err (!%p1396_p3)
}
  0x81   : > { %1171 = dma.hbm_to_vmem [thread:$0]  (!%p1696_p7), %s1703_s25, 64, %s392_s11, %s381_s18  }
  0x82   : > { %p1906_p6 = scmp.ne.s32.totalorder %s1893_s20, 0 }
  0x83   : > { %s1754_s30 = sand.u32 (!%p1906_p6), 1, %s1472_s14   ;;  %p1907_p10 = scmp.ne.s32.totalorder (!%p1906_p6), %s1902_s27, 0 }
  0x84   : > { %400 = sbr.rel (%p1906_p6) target bundleno = 1293 (0x50d), region = 56  ;;  %s1757_s15 = sshll.u32 (!%p1906_p6), %s1754_s30, 2 }
  0x85   : > { %s403_s23 = scalar_lea.sflag (!%p1906_p6), [#allocation3], %s1754_s30  ;;  %s406_s4 = scalar_lea.vmem (!%p1906_p6), [#allocation2], %s1757_s15 }
  0x89   : > { %1443 = dma.done.wait (%p1907_p10), %s403_s23, 64  }
  0x8a   : > { %1445 = vsyncadd (%p1907_p10), %s403_s23, 4294967232  ;;  %s411_s2 = sand.u32 1, %s1569_s19   ;;  %s415_s25 = scalar_lea.vmem [#allocation5], %s1757_s15 }
  0x8b   : > { %s412_s20 = scalar_lea.sflag [#allocation6], %s411_s2 }
  0x8c   : > { %1447 = dma.done.wait (%p1907_p10), %s412_s20, 64  }
  0x8d   : > { %1449 = vsyncadd (%p1907_p10), %s412_s20, 4294967232  ;;  %p1908_p3 = scmp.eq.s32.totalorder %s1569_s19, 0 }
  0x8f   : > { %1451 = dma.done.wait (%p1908_p3), [#allocation6], 256   ;;  %p1909_p7 = pmov %p1908_p3 }
  0x90   : > { %p1910_p5 = pmov %p1908_p3 }
  0x91   : > { %1453 = vsyncadd (%p1909_p7), [#allocation6], 4294967040 }
  0x92   : > { %1455 = dma.done.wait (%p1910_p5), [#allocation9], 512   ;;  %p1911_p8 = pmov %p1908_p3 }
  0x93   : > { %p1912_p12 = pmov %p1908_p3 }
  0x94   : > { %1457 = vsyncadd (%p1911_p8), [#allocation9], 4294966784 }
  0x95   : > { %1459 = dma.done.wait (%p1912_p12), [#allocation12], 256   ;;  %p1913_p0 = pmov %p1908_p3 }
  0x96   : > { %v1490_v0 = vmov 0.0   ;;  %vm1491_vm0 = vmmov 0   ;;  %v1226_v1 = vld [vmem:[#allocation7 + $0x8] sm:$0xff]   ;;  %v1227_v2 = vld [vmem:[#allocation7] sm:$0xff]   ;;  %v1228_v3 = vld [vmem:[#allocation8 + $0x8] sm:$0xff]   ;;  %vm506_vm1 = vcmask 261120  }
  0x97   : > { %1461 = vsyncadd (%p1913_p0), [#allocation12], 4294967040  ;;  %1086 = vmatprep.subr.bf16.mxu0 %v1490_v0  ;;  %1090 = vmatprep.mubr.msk.bf16.mxu0 %vm1491_vm0, %v1490_v0  ;;  %v482_v4 = vld [vmem:[%s406_s4] sm:$0xf]  ;;  %v552_v6 = vld [vmem:[%s415_s25] sm:$0xf] }
  0x98   : > { %1094 = vmatprep.subr.bf16.mxu1 %v1490_v0  ;;  %1098 = vmatprep.mubr.msk.bf16.mxu1 %vm1491_vm0, %v1490_v0  ;;  %v1229_v5 = vld [vmem:[#allocation8] sm:$0xff]   ;;  %vm682_vm2 = vcmask 1043456   ;;  %v1230_v24 = vld [vmem:[#allocation11 + $0x8] sm:$0xff]   ;;  %vm666_vm3 = vcmask 64512   ;;  %p477_p2 = scmp.lt.s32.totalorder %s1569_s19, 1  ;;  %vm851_vm4 = vcmask 60416  }
  0x99   : > { %1087 = vmatpush3.bf16.msra.mxu0 %v1226_v1  ;;  %1095 = vmatpush3.bf16.msra.mxu1 %v1228_v3  ;;  %v1049_v7 = vld [vmem:[%s1873_s3] ss:$0 sm:$0xff]  ;;  %v1232_v43 = vld [vmem:[#allocation10 + $0x8] sm:$0xff]   ;;  %v1233_v45 = vld [vmem:[#allocation10] sm:$0xff]   ;;  %s1067_s23 = sshll.u32 %s1569_s19, 6  ;;  %s470_s4 = scalar_lea.vmem [#allocation13], %s1757_s15 }
  0x9a   : > { %1088 = vmatprep.subr.bf16.mxu0 %v1490_v0  ;;  %1096 = vmatprep.subr.bf16.mxu1 %v1490_v0  ;;  %v1053_v18 = vld [vmem:[%s1875_s5] ss:$0 sm:$0xff]  ;;  %s478_s28 = scalar_select %p477_p2, %s1569_s19, 1 }
  0x9b   : > { %v1231_v25 = vld [vmem:[#allocation11] sm:$0xff]   ;;  %s871_s2 = sshll.u32 %s470_s4, 4  ;;  %s1833_s27 = scalar_lea.hbm %s1879_s9, %s1067_s23  ;;  %s872_s2 = int_to_ptr.vmem [resolvable:$true] %s871_s2 }
  0x9c   : > { %s1048_s29 = sshll.u32 %s478_s28, 2  ;;  %v1065_v52 = vld [vmem:[%s1878_s8] ss:$0 sm:$0xff]  ;;  %s854_s11 = scalar_lea.sflag [#allocation4], %s1754_s30 }
  0x9d   : > { %1089 = vmatpush3.bf16.msra.mxu0 %v1227_v2  ;;  %1097 = vmatpush3.bf16.msra.mxu1 %v1229_v5  ;;  %s480_s26 = scalar_lea.vmem %s1880_s10, %s1048_s29  ;;  %s1400_s18 = scalar_lea.vmem %s872_s2, 64 }
  0x9e   : > { %1102 = vmatprep.subr.bf16.mxu0 %v1490_v0  ;;  %1108 = vmatprep.subr.bf16.mxu1 %v1490_v0  ;;  %p1401_p9 = scmp.ne.s32.totalorder %s872_s2, %s1400_s18  ;;  %p1914_p11 = scmp.ne.s32.totalorder %s1903_s22, 0 }
  0x9f   : > { %s1492_s19 = smov [#allocation13]  }
  0xa0   : > { %1091 = vmatmul.mubr.msk.bf16.vlgmr.msra.gmra.mxu0 %vm506_vm1, %v482_v4  ;;  %1099 = vmatmul.mubr.msk.bf16.vlgmr.msra.gmra.mxu1 %vm506_vm1, %v552_v6  ;;  %p1402_p13 = pnand %p1401_p9, %p1914_p11  ;;  %s1404_s15 = sshll.u32 %s1492_s19, 4  ;;  %s1405_s15 = int_to_ptr.vmem [resolvable:$false] %s1404_s15 }
  0xa1   : > { %1104 = vmatprep.mubr.msk.bf16.mxu0 %vm1491_vm0, %v1490_v0  ;;  %1110 = vmatprep.mubr.msk.bf16.mxu1 %vm1491_vm0, %v1490_v0  ;;  %s1406_s6 = scalar_lea.vmem %s1405_s15, 128  ;;  %p1407_p4 = scmp.lt.s32.totalorder %s872_s2, %s1405_s15 }
  0xa2   : > { %p1403_p1 = pneg %p1402_p13  ;;  %p1408_p6 = scmp.lt.s32.totalorder %s1406_s6, %s1400_s18 }
  0xa4   : > { %p1409_p10 = por %p1408_p6, %p1407_p4 }
  0xa6   : > { %p1410_p3 = pnand %p1409_p10, %p1403_p1 }
 0x160   : > { %v544_v8 = vpop.f32.mrf.mxu0  ;;  %v613_v11 = vpop.f32.mrf.mxu1 }
 0x161   : > { %v545_v9 = vadd.f32 %v1049_v7, %v544_v8  ;;  %v614_v20 = vadd.f32 %v1053_v18, %v613_v11 }
 0x162   : > { %v1092_v10 = vpop.f32.mrf.mxu0  ;;  %v1100_v13 = vpop.f32.mrf.mxu1 }
 0x163   : > { %1234 = vtanh.f32 %v545_v9  ;;  %v619_v23 = vpack.c.bf16 %v614_v20, %v614_v20 }
 0x164   : > { %v547_v12 = vpop.f32.mrf.mxu0  ;;  %v616_v15 = vpop.f32.mrf.mxu1 }
 0x166   : > { %v1093_v14 = vpop.f32.mrf.mxu0  ;;  %v1101_v16 = vpop.f32.mrf.mxu1 }
 0x170   : > { %v1235_v17 = vpop.eup %1234 }
 0x171   : > { %v551_v19 = vpack.c.bf16 %v1235_v17, %v1235_v17 }
 0x173   : > { %v624_v21 = vsel %vm506_vm1, %v551_v19, 0  ;;  %v683_v22 = vsel %vm682_vm2, %v551_v19, 0 }
 0x174   : > { %1103 = vmatpush3.bf16.xpose.msra.mxu0 %v624_v21  ;;  %1109 = vmatpush3.bf16.msra.mxu1 %v683_v22 }
 0x175   : > { %1114 = vmatprep.subr.bf16.mxu0 %v1490_v0  ;;  %1122 = vmatprep.subr.bf16.mxu1 %v1490_v0 }
 0x17b   : > { %1105 = vmatmul.mubr.msk.bf16.vlgmr.msra.gmra.mxu0 %vm506_vm1, %v619_v23 }
 0x17c   : > { %1115 = vmatpush3.bf16.msra.mxu0 %v1230_v24  ;;  %1118 = vmatprep.mubr.msk.bf16.mxu0 %vm1491_vm0, %v1490_v0 }
 0x17d   : > { %1116 = vmatprep.subr.bf16.mxu0 %v1490_v0 }
 0x180   : > { %1117 = vmatpush3.bf16.msra.mxu0 %v1231_v25 }
 0x183   : > { %1119 = vmatmul.mubr.msk.bf16.vlgmr.msra.gmra.mxu0 %vm506_vm1, %v619_v23 }
 0x23b   : > { %v660_v26 = vpop.f32.mrf.mxu0 }
 0x23c   : > { %v667_v27 = vsel %vm666_vm3, %v660_v26, -inf }
 0x23d   : > { %668 = vmax.xlane.f32.xlu0 %v667_v27  ;;  %v1106_v28 = vpop.f32.mrf.mxu0 }
 0x23f   : > { %v663_v29 = vpop.f32.mrf.mxu0 }
 0x241   : > { %v1107_v30 = vpop.f32.mrf.mxu0 }
 0x243   : > { %v780_v31 = vpop.f32.mrf.mxu0 }
 0x245   : > { %v1120_v32 = vpop.f32.mrf.mxu0 }
 0x247   : > { %v783_v33 = vpop.f32.mrf.mxu0 }
 0x249   : > { %v1121_v34 = vpop.f32.mrf.mxu0 }
 0x2c6   : > { %v669_v35 = vpop.xlane.xlu0 %668 }
 0x2c7   : > { %v670_v36 = vsub.f32 %v660_v26, %v669_v35 }
 0x2c9   : > { %v671_v37 = vmul.f32 1.442695, %v670_v36 }
 0x2cb   : > { %1236 = vpow2.f32 %v671_v37 }
 0x2d8   : > { %v1237_v38 = vpop.eup %1236 }
 0x2d9   : > { %v673_v39 = vsel %vm666_vm3, %v1237_v38, 0.0 }
 0x2da   : > { %674 = vadd.xlane.f32.xlu0 %v673_v39 }
 0x363   : > { %v675_v40 = vpop.xlane.xlu0 %674 }
 0x364   : > { %1238 = vrcp.f32 %v675_v40 }
 0x371   : > { %v1239_v41 = vpop.eup %1238 }
 0x372   : > { %v677_v42 = vmul.f32 %v1239_v41, %v1237_v38 }
 0x374   : > { %v678_v44 = vpack.c.bf16 %v677_v42, %v677_v42 }
 0x376   : > { %1111 = vmatmul.mubr.msk.bf16.vlgmr.msra.gmra.mxu1 %vm666_vm3, %v678_v44  ;;  %852 = vst.msk [vmem:[%s480_s26] sm:$0xf] %vm851_vm4, %v678_v44 }
 0x377   : > { %1123 = vmatpush3.bf16.msra.mxu1 %v1232_v43  ;;  %1126 = vmatprep.mubr.msk.bf16.mxu1 %vm1491_vm0, %v1490_v0 }
 0x378   : > { %1124 = vmatprep.subr.bf16.mxu1 %v1490_v0 }
 0x37b   : > { %1125 = vmatpush3.bf16.msra.mxu1 %v1233_v45 }
 0x436   : > { %v719_v46 = vpop.f32.mrf.mxu1 }
 0x437   : > { %v725_v47 = vpack.c.bf16 %v719_v46, %v719_v46 }
 0x438   : > { %v1112_v48 = vpop.f32.mrf.mxu1 }
 0x439   : > { %1127 = vmatmul.mubr.msk.bf16.vlgmr.msra.gmra.mxu1 %vm506_vm1, %v725_v47 }
 0x43a   : > { %v722_v49 = vpop.f32.mrf.mxu1 }
 0x43c   : > { %v1113_v50 = vpop.f32.mrf.mxu1 }
 0x4f9   : > { %v835_v51 = vpop.f32.mrf.mxu1 }
 0x4fa   : > { %v836_v53 = vadd.f32 %v835_v51, %v780_v31 }
 0x4fb   : > { %v1128_v54 = vpop.f32.mrf.mxu1 }
 0x4fc   : > { %v848_v55 = vadd.f32 %v1065_v52, %v836_v53 }
 0x4fd   : > { %v838_v56 = vpop.f32.mrf.mxu1 }
 0x4fe   : > { %v849_v57 = vpack.c.bf16 %v848_v55, %v848_v55 }
 0x4ff   : > { %v1129_v58 = vpop.f32.mrf.mxu1 }
 0x500   : > { %850 = vst [vmem:[%s470_s4] sm:$0xf] %v849_v57 }
 0x501   : > { %1413 = shalt.err (!%p1410_p3)
}
 0x502   : > { %s1414_s28 = scalar_lea.hbm %s1833_s27, 64  ;;  %s1418_s21 = scalar_lea.hbm %s1879_s9, 128 }
 0x503   : > { %p1415_p7 = scmp.ne.s32.totalorder %s1833_s27, %s1414_s28  ;;  %p1419_p12 = scmp.lt.s32.totalorder %s1833_s27, %s1879_s9 }
 0x504   : > { %p1420_p0 = scmp.lt.s32.totalorder %s1418_s21, %s1414_s28 }
 0x505   : > { %p1416_p5 = pnand %p1415_p7, %p1914_p11 }
 0x506   : > { %p1421_p2 = por %p1420_p0, %p1419_p12 }
 0x507   : > { %p1417_p8 = pneg %p1416_p5 }
 0x509   : > { %p1422_p9 = pnand %p1421_p2, %p1417_p8 }
 0x50b   : > { %1425 = shalt.err (!%p1422_p9)
}
 0x50c   : > { %1150 = dma.vmem_to_hbm [thread:$0]  (%p1914_p11), %s872_s2, 64, %s1833_s27, %s854_s11  }
 0x50d PF: > { %s886_s12 = sand.u32 1, %s1468_s13   ;;  %p1915_p13 = scmp.ne.s32.totalorder %s1904_s24, 0 }
 0x50e   : > { %p1916_p1 = scmp.ge.s32.totalorder %s1480_s16, 2  ;;  %s887_s17 = scalar_lea.sflag [#allocation4], %s886_s12 }
 0x510   : > { %p1173_p4 = pnand %p1916_p1, %p1915_p13 }
 0x512   : > { %p1174_p6 = pneg %p1173_p4 }
 0x514   : > { %1463 = dma.done.wait (%p1174_p6), %s887_s17, 64  }
 0x515   : > { %1465 = vsyncadd (%p1174_p6), %s887_s17, 4294967232  ;;  %s1917_s16 = sld [smem:[#allocation21_spill]]  ;;  %s1920_s13 = smov %s1472_s14 }
 0x516   : > { %s1918_s23 = sld [smem:[#allocation20_spill]] }
 0x517   : > { %s1919_s15 = sld [smem:[#allocation22_spill]] }
 0x51b   : > { %p29_p10 = scmp.ge.s32.totalorder %s1917_s16, 4  }
 0x51c   : > { %s1921_s14 = smov %s1918_s23 }
 0x51d   :  { %31 = sbr.rel (!%p29_p10) target bundleno = 14 (0xe), region = 142 }
 0x522   :  { %899 = vsyncpa [#allocation3], 1 }
 0x523   :  { %901 = vsyncpa [#allocation3 + $0x1], 1 }
 0x524   :  { %902 = vsyncpa [#allocation6], 1 }
 0x525   :  { %904 = vsyncpa [#allocation6 + $0x1], 1 }
 0x526   :  { %905 = vsyncpa [#allocation9], 1 }
 0x527   :  { %906 = vsyncpa [#allocation12], 1 }
 0x528   :  { %907 = vsyncpa [#allocation4], 1 }
 0x529   :  { %909 = vsyncpa [#allocation4 + $0x1], 1 }

</bundles_post_ra>
